<compile_context>
chip_gen: v7x
topology: tpu7x:2x2x1
jax: 0.10.0
libtpu: 0.0.40
codegen_flags: <defaults>
</compile_context>

<pallas_src>
import jax
import jax.numpy as jnp
from jax.experimental import pallas as pl
from jax.experimental.pallas import tpu as pltpu


def _add_relu_kernel(a_ref, b_ref, o_ref):
    # fused elementwise hot path on the VPU: one add + one max per vreg
    o_ref[...] = jnp.maximum(a_ref[...] + b_ref[...], jnp.zeros((), o_ref.dtype))


def _is_v7x():
    try:
        kind = jax.devices()[0].device_kind.lower()
    except Exception:
        return False
    return "v7" in kind


# Static at trace time: how many sublane-slabs to shard the grid across.
_NUM_TC_SPLIT = 2 if _is_v7x() else 1


def _lane_dense_2d(total, preferred_rows):
    """Pick (rows, cols): sublane-friendly rows, long lane-dense last dim
    (pad-to-128 waste <= 127 elements of `cols`)."""
    for rows in (preferred_rows, 16, 8, 32, 4, 2, 1):
        if total % rows == 0:
            return rows, total // rows
    return 1, total


def _add_relu_impl(x79, x87):
    assert x79.shape == x87.shape and x79.dtype == x87.dtype
    orig_shape = x79.shape
    total = x79.size  # static Python int

    rows, cols = _lane_dense_2d(total, 8 * _NUM_TC_SPLIT)
    # Split along the sublane (rows) axis only when it divides cleanly into
    # 8-row blocks; otherwise fall back to a single full-array block.
    if _NUM_TC_SPLIT > 1 and rows % (8 * _NUM_TC_SPLIT) == 0:
        block_rows = rows // _NUM_TC_SPLIT
    else:
        block_rows = rows
    grid_n = rows // block_rows

    a = x79.reshape(rows, cols)
    b = x87.reshape(rows, cols)

    # Block spans the full lane width (cols == array cols), so the (8,128)
    # divisibility rule is satisfied without masking on every path.
    spec = pl.BlockSpec((block_rows, cols), lambda i: (i, 0))
    out2d = pl.pallas_call(
        _add_relu_kernel,
        out_shape=jax.ShapeDtypeStruct((rows, cols), a.dtype),
        grid=(grid_n,),
        in_specs=[spec, spec],
        out_specs=spec,
        input_output_aliases={0: 0},  # output reuses x79's buffer
        compiler_params=pltpu.CompilerParams(
            dimension_semantics=("parallel",),
        ),
        cost_estimate=pl.CostEstimate(
            flops=2 * total,
            transcendentals=0,
            bytes_accessed=3 * total * a.dtype.itemsize,
        ),
    )(a, b)

    return out2d.reshape(orig_shape)


add_relu = jax.jit(_add_relu_impl, donate_argnums=(0,))


if __name__ == "__main__":
    key = jax.random.PRNGKey(0)
    k1, k2 = jax.random.split(key)
    # shapes from the module: torch.Size([1, 720, 14, 14])
    x79 = jax.random.normal(k1, (1, 720, 14, 14), dtype=jnp.float32)
    x87 = jax.random.normal(k2, (1, 720, 14, 14), dtype=jnp.float32)

    # compute the pure-JAX reference BEFORE the call (x79's buffer is donated)
    ref = jnp.maximum(x79 + x87, 0.0)
    ref = jax.block_until_ready(ref)

    out = add_relu(x79, x87)
    out = jax.block_until_ready(out)

    assert out.shape == (1, 720, 14, 14)
    assert out.dtype == jnp.float32
    assert bool(jnp.allclose(out, ref, atol=1e-6, rtol=1e-6))

    print("KERNEL_OK")
</pallas_src>

<mosaic_0001>
module attributes {stable_mosaic.version = 11 : i64} {
  func.func @_add_relu_kernel(%arg0: i32, %arg1: memref<8x17640xf32, #tpu.memory_space<vmem>>, %arg2: memref<8x17640xf32, #tpu.memory_space<vmem>>, %arg3: memref<8x17640xf32, #tpu.memory_space<vmem>>) attributes {dimension_semantics = [#tpu.dimension_semantics<parallel>], iteration_bounds = array<i64: 1>, scalar_prefetch = 0 : i64, scratch_operands = 0 : i64, tpu.core_type = #tpu.core_type<tc>, window_params = [{transform_indices = @transform_0, window_bounds = array<i64: 8, 17640>}, {transform_indices = @transform_1, window_bounds = array<i64: 8, 17640>}, {transform_indices = @transform_2, window_bounds = array<i64: 8, 17640>}]} {
    %c0 = arith.constant 0 : index
    %c0_0 = arith.constant 0 : index
    %0 = vector.load %arg1[%c0, %c0_0] : memref<8x17640xf32, #tpu.memory_space<vmem>>, vector<8x17640xf32>
    %c0_1 = arith.constant 0 : index
    %c0_2 = arith.constant 0 : index
    %1 = vector.load %arg2[%c0_1, %c0_2] : memref<8x17640xf32, #tpu.memory_space<vmem>>, vector<8x17640xf32>
    %2 = arith.addf %0, %1 : vector<8x17640xf32>
    %cst = arith.constant 0.000000e+00 : f32
    %3 = vector.broadcast %cst : f32 to vector<8x17640xf32>
    %4 = arith.maximumf %2, %3 : vector<8x17640xf32>
    %c0_3 = arith.constant 0 : index
    %c0_4 = arith.constant 0 : index
    %5 = vector.load %arg3[%c0_3, %c0_4] : memref<8x17640xf32, #tpu.memory_space<vmem>>, vector<8x17640xf32>
    tpu.vector_store %arg3[%c0_3, %c0_4], %4 {strides = array<i32>} : memref<8x17640xf32, #tpu.memory_space<vmem>>, vector<8x17640xf32>,
    return
  }
  func.func @transform_0(%arg0: i32) -> (i32, i32) {
    %c0_i32 = arith.constant 0 : i32
    %c0_i32_0 = arith.constant 0 : i32
    return %arg0, %c0_i32 : i32, i32
  }
  func.func @transform_1(%arg0: i32) -> (i32, i32) {
    %c0_i32 = arith.constant 0 : i32
    %c0_i32_0 = arith.constant 0 : i32
    return %arg0, %c0_i32 : i32, i32
  }
  func.func @transform_2(%arg0: i32) -> (i32, i32) {
    %c0_i32 = arith.constant 0 : i32
    %c0_i32_0 = arith.constant 0 : i32
    return %arg0, %c0_i32 : i32, i32
  }
}

</mosaic_0001>

<bundles_post_ra>
// kernel: _add_relu_impl.1
= control target key start
LH: loop header
LB: loop body
LE: loop exit
PB: predicated region body
PF: predicated region fallthrough
CT: control target
= control target key end

     0   :  { %vm700_vm0 = vcmask 850944   ;;  %s1963_s0 = inlined_call_operand.vmem [shape: f32[8,17640], index: 0, kind: input, shape index: {}, may-alias: {0,2}]   ;;  %s1964_s1 = inlined_call_operand.vmem [shape: f32[8,17640], index: 1, kind: input, shape index: {}]   ;;  %s1965_s2 = inlined_call_operand.vmem [shape: f32[8,17640], index: 2, kind: output, shape index: {}, may-alias: {0,2}]  }
   0x1   :  { %v11_v0 = vld [vmem:[%s1963_s0] sm:$0xff]  ;;  %v12_v2 = vld [vmem:[%s1963_s0 + $0x8] sm:$0xff]  ;;  %v13_v5 = vld [vmem:[%s1963_s0 + $0x10] sm:$0xff] }
   0x2   :  { %v149_v1 = vld [vmem:[%s1964_s1] sm:$0xff]  ;;  %v150_v4 = vld [vmem:[%s1964_s1 + $0x8] sm:$0xff]  ;;  %v151_v6 = vld [vmem:[%s1964_s1 + $0x10] sm:$0xff] }
   0x3   :  { %v287_v3 = vadd.f32 %v149_v1, %v11_v0  ;;  %v288_v7 = vadd.f32 %v150_v4, %v12_v2  ;;  %v289_v8 = vadd.f32 %v151_v6, %v13_v5  ;;  %v14_v9 = vld [vmem:[%s1963_s0 + $0x18] sm:$0xff]  ;;  %v15_v11 = vld [vmem:[%s1963_s0 + $0x20] sm:$0xff]  ;;  %v16_v15 = vld [vmem:[%s1963_s0 + $0x28] sm:$0xff] }
   0x4   :  { %v152_v10 = vld [vmem:[%s1964_s1 + $0x18] sm:$0xff]  ;;  %v153_v14 = vld [vmem:[%s1964_s1 + $0x20] sm:$0xff]  ;;  %v154_v16 = vld [vmem:[%s1964_s1 + $0x28] sm:$0xff] }
   0x5   :  { %v425_v12 = vmax.f32 %v287_v3, 0.0  ;;  %v290_v13 = vadd.f32 %v152_v10, %v14_v9  ;;  %v426_v17 = vmax.f32 %v288_v7, 0.0  ;;  %v427_v18 = vmax.f32 %v289_v8, 0.0  ;;  %v17_v21 = vld [vmem:[%s1963_s0 + $0x30] sm:$0xff]  ;;  %v18_v23 = vld [vmem:[%s1963_s0 + $0x38] sm:$0xff]  ;;  %v157_v28 = vld [vmem:[%s1964_s1 + $0x40] sm:$0xff] }
   0x6   :  { %v291_v19 = vadd.f32 %v153_v14, %v15_v11  ;;  %v292_v20 = vadd.f32 %v154_v16, %v16_v15  ;;  %v155_v22 = vld [vmem:[%s1964_s1 + $0x30] sm:$0xff]  ;;  %v156_v26 = vld [vmem:[%s1964_s1 + $0x38] sm:$0xff]  ;;  %v158_v34 = vld [vmem:[%s1964_s1 + $0x48] sm:$0xff] }
   0x7   :  { %563 = vst [vmem:[%s1965_s2] sm:$0xff] %v425_v12  ;;  %v428_v24 = vmax.f32 %v290_v13, 0.0  ;;  %v293_v25 = vadd.f32 %v155_v22, %v17_v21  ;;  %v294_v31 = vadd.f32 %v156_v26, %v18_v23  ;;  %v159_v38 = vld [vmem:[%s1964_s1 + $0x50] sm:$0xff]  ;;  %v160_v40 = vld [vmem:[%s1964_s1 + $0x58] sm:$0xff]  ;;  %v161_v46 = vld [vmem:[%s1964_s1 + $0x60] sm:$0xff] }
   0x8   :  { %v429_v29 = vmax.f32 %v291_v19, 0.0  ;;  %v430_v30 = vmax.f32 %v292_v20, 0.0  ;;  %v162_v50 = vld [vmem:[%s1964_s1 + $0x68] sm:$0xff]  ;;  %v163_v52 = vld [vmem:[%s1964_s1 + $0x70] sm:$0xff]  ;;  %v164_v58 = vld [vmem:[%s1964_s1 + $0x78] sm:$0xff] }
   0x9   :  { %v431_v36 = vmax.f32 %v293_v25, 0.0  ;;  %v432_v41 = vmax.f32 %v294_v31, 0.0  ;;  %v165_v62 = vld [vmem:[%s1964_s1 + $0x80] sm:$0xff]  ;;  %v166_v0 = vld [vmem:[%s1964_s1 + $0x88] sm:$0xff]  ;;  %v167_v6 = vld [vmem:[%s1964_s1 + $0x90] sm:$0xff] }
   0xa   :  { %v168_v10 = vld [vmem:[%s1964_s1 + $0x98] sm:$0xff]  ;;  %v169_v12 = vld [vmem:[%s1964_s1 + $0xa0] sm:$0xff]  ;;  %v171_v22 = vld [vmem:[%s1964_s1 + $0xb0] sm:$0xff] }
   0xe   :  { %v19_v27 = vld [vmem:[%s1963_s0 + $0x40] sm:$0xff] }
   0xf   :  { %564 = vst [vmem:[%s1965_s2 + $0x8] sm:$0xff] %v426_v17  ;;  %565 = vst [vmem:[%s1965_s2 + $0x10] sm:$0xff] %v427_v18  ;;  %v295_v32 = vadd.f32 %v157_v28, %v19_v27  ;;  %v170_v18 = vld [vmem:[%s1964_s1 + $0xa8] sm:$0xff] }
  0x11   :  { %v433_v42 = vmax.f32 %v295_v32, 0.0 }
  0x16   :  { %v20_v33 = vld [vmem:[%s1963_s0 + $0x48] sm:$0xff]  ;;  %v21_v35 = vld [vmem:[%s1963_s0 + $0x50] sm:$0xff] }
  0x17   :  { %566 = vst [vmem:[%s1965_s2 + $0x18] sm:$0xff] %v428_v24  ;;  %v296_v37 = vadd.f32 %v158_v34, %v20_v33  ;;  %v297_v43 = vadd.f32 %v159_v38, %v21_v35  ;;  %v172_v24 = vld [vmem:[%s1964_s1 + $0xb8] sm:$0xff]  ;;  %v174_v34 = vld [vmem:[%s1964_s1 + $0xc8] sm:$0xff] }
  0x19   :  { %v434_v48 = vmax.f32 %v296_v37, 0.0  ;;  %v435_v53 = vmax.f32 %v297_v43, 0.0 }
  0x1e   :  { %v22_v39 = vld [vmem:[%s1963_s0 + $0x58] sm:$0xff] }
  0x1f   :  { %567 = vst [vmem:[%s1965_s2 + $0x20] sm:$0xff] %v429_v29  ;;  %568 = vst [vmem:[%s1965_s2 + $0x28] sm:$0xff] %v430_v30  ;;  %v298_v44 = vadd.f32 %v160_v40, %v22_v39  ;;  %v173_v30 = vld [vmem:[%s1964_s1 + $0xc0] sm:$0xff] }
  0x21   :  { %v436_v54 = vmax.f32 %v298_v44, 0.0 }
  0x26   :  { %v23_v45 = vld [vmem:[%s1963_s0 + $0x60] sm:$0xff]  ;;  %v24_v47 = vld [vmem:[%s1963_s0 + $0x68] sm:$0xff] }
  0x27   :  { %569 = vst [vmem:[%s1965_s2 + $0x30] sm:$0xff] %v431_v36  ;;  %v299_v49 = vadd.f32 %v161_v46, %v23_v45  ;;  %v300_v55 = vadd.f32 %v162_v50, %v24_v47  ;;  %v175_v36 = vld [vmem:[%s1964_s1 + $0xd0] sm:$0xff]  ;;  %v177_v46 = vld [vmem:[%s1964_s1 + $0xe0] sm:$0xff] }
  0x29   :  { %v437_v60 = vmax.f32 %v299_v49, 0.0  ;;  %v438_v1 = vmax.f32 %v300_v55, 0.0 }
  0x2e   :  { %v25_v51 = vld [vmem:[%s1963_s0 + $0x70] sm:$0xff] }
  0x2f   :  { %570 = vst [vmem:[%s1965_s2 + $0x38] sm:$0xff] %v432_v41  ;;  %571 = vst [vmem:[%s1965_s2 + $0x40] sm:$0xff] %v433_v42  ;;  %v301_v56 = vadd.f32 %v163_v52, %v25_v51  ;;  %v176_v42 = vld [vmem:[%s1964_s1 + $0xd8] sm:$0xff] }
  0x31   :  { %v439_v2 = vmax.f32 %v301_v56, 0.0 }
  0x36   :  { %v26_v57 = vld [vmem:[%s1963_s0 + $0x78] sm:$0xff]  ;;  %v27_v59 = vld [vmem:[%s1963_s0 + $0x80] sm:$0xff] }
  0x37   :  { %572 = vst [vmem:[%s1965_s2 + $0x48] sm:$0xff] %v434_v48  ;;  %v302_v61 = vadd.f32 %v164_v58, %v26_v57  ;;  %v303_v3 = vadd.f32 %v165_v62, %v27_v59  ;;  %v178_v48 = vld [vmem:[%s1964_s1 + $0xe8] sm:$0xff]  ;;  %v180_v58 = vld [vmem:[%s1964_s1 + $0xf8] sm:$0xff] }
  0x39   :  { %v440_v8 = vmax.f32 %v302_v61, 0.0  ;;  %v441_v13 = vmax.f32 %v303_v3, 0.0 }
  0x3e   :  { %v28_v63 = vld [vmem:[%s1963_s0 + $0x88] sm:$0xff] }
  0x3f   :  { %573 = vst [vmem:[%s1965_s2 + $0x50] sm:$0xff] %v435_v53  ;;  %574 = vst [vmem:[%s1965_s2 + $0x58] sm:$0xff] %v436_v54  ;;  %v304_v4 = vadd.f32 %v166_v0, %v28_v63  ;;  %v179_v54 = vld [vmem:[%s1964_s1 + $0xf0] sm:$0xff] }
  0x41   :  { %v442_v14 = vmax.f32 %v304_v4, 0.0 }
  0x46   :  { %v29_v5 = vld [vmem:[%s1963_s0 + $0x90] sm:$0xff]  ;;  %v30_v7 = vld [vmem:[%s1963_s0 + $0x98] sm:$0xff] }
  0x47   :  { %575 = vst [vmem:[%s1965_s2 + $0x60] sm:$0xff] %v437_v60  ;;  %v305_v9 = vadd.f32 %v167_v6, %v29_v5  ;;  %v306_v15 = vadd.f32 %v168_v10, %v30_v7  ;;  %v181_v60 = vld [vmem:[%s1964_s1 + $0x100] sm:$0xff]  ;;  %v183_v6 = vld [vmem:[%s1964_s1 + $0x110] sm:$0xff] }
  0x49   :  { %v443_v20 = vmax.f32 %v305_v9, 0.0  ;;  %v444_v25 = vmax.f32 %v306_v15, 0.0 }
  0x4e   :  { %v31_v11 = vld [vmem:[%s1963_s0 + $0xa0] sm:$0xff] }
  0x4f   :  { %576 = vst [vmem:[%s1965_s2 + $0x68] sm:$0xff] %v438_v1  ;;  %577 = vst [vmem:[%s1965_s2 + $0x70] sm:$0xff] %v439_v2  ;;  %v307_v16 = vadd.f32 %v169_v12, %v31_v11  ;;  %v182_v2 = vld [vmem:[%s1964_s1 + $0x108] sm:$0xff] }
  0x51   :  { %v445_v26 = vmax.f32 %v307_v16, 0.0 }
  0x56   :  { %v32_v17 = vld [vmem:[%s1963_s0 + $0xa8] sm:$0xff]  ;;  %v33_v19 = vld [vmem:[%s1963_s0 + $0xb0] sm:$0xff] }
  0x57   :  { %578 = vst [vmem:[%s1965_s2 + $0x78] sm:$0xff] %v440_v8  ;;  %v308_v21 = vadd.f32 %v170_v18, %v32_v17  ;;  %v309_v27 = vadd.f32 %v171_v22, %v33_v19  ;;  %v184_v8 = vld [vmem:[%s1964_s1 + $0x118] sm:$0xff]  ;;  %v186_v18 = vld [vmem:[%s1964_s1 + $0x128] sm:$0xff] }
  0x59   :  { %v446_v32 = vmax.f32 %v308_v21, 0.0  ;;  %v447_v37 = vmax.f32 %v309_v27, 0.0 }
  0x5e   :  { %v34_v23 = vld [vmem:[%s1963_s0 + $0xb8] sm:$0xff] }
  0x5f   :  { %579 = vst [vmem:[%s1965_s2 + $0x80] sm:$0xff] %v441_v13  ;;  %580 = vst [vmem:[%s1965_s2 + $0x88] sm:$0xff] %v442_v14  ;;  %v310_v28 = vadd.f32 %v172_v24, %v34_v23  ;;  %v185_v14 = vld [vmem:[%s1964_s1 + $0x120] sm:$0xff] }
  0x61   :  { %v448_v38 = vmax.f32 %v310_v28, 0.0 }
  0x66   :  { %v35_v29 = vld [vmem:[%s1963_s0 + $0xc0] sm:$0xff]  ;;  %v36_v31 = vld [vmem:[%s1963_s0 + $0xc8] sm:$0xff] }
  0x67   :  { %581 = vst [vmem:[%s1965_s2 + $0x90] sm:$0xff] %v443_v20  ;;  %v311_v33 = vadd.f32 %v173_v30, %v35_v29  ;;  %v312_v39 = vadd.f32 %v174_v34, %v36_v31  ;;  %v187_v20 = vld [vmem:[%s1964_s1 + $0x130] sm:$0xff]  ;;  %v189_v30 = vld [vmem:[%s1964_s1 + $0x140] sm:$0xff] }
  0x69   :  { %v449_v44 = vmax.f32 %v311_v33, 0.0  ;;  %v450_v49 = vmax.f32 %v312_v39, 0.0 }
  0x6e   :  { %v37_v35 = vld [vmem:[%s1963_s0 + $0xd0] sm:$0xff] }
  0x6f   :  { %582 = vst [vmem:[%s1965_s2 + $0x98] sm:$0xff] %v444_v25  ;;  %583 = vst [vmem:[%s1965_s2 + $0xa0] sm:$0xff] %v445_v26  ;;  %v313_v40 = vadd.f32 %v175_v36, %v37_v35  ;;  %v188_v26 = vld [vmem:[%s1964_s1 + $0x138] sm:$0xff] }
  0x71   :  { %v451_v50 = vmax.f32 %v313_v40, 0.0 }
  0x76   :  { %v38_v41 = vld [vmem:[%s1963_s0 + $0xd8] sm:$0xff]  ;;  %v39_v43 = vld [vmem:[%s1963_s0 + $0xe0] sm:$0xff] }
  0x77   :  { %584 = vst [vmem:[%s1965_s2 + $0xa8] sm:$0xff] %v446_v32  ;;  %v314_v45 = vadd.f32 %v176_v42, %v38_v41  ;;  %v315_v51 = vadd.f32 %v177_v46, %v39_v43  ;;  %v190_v32 = vld [vmem:[%s1964_s1 + $0x148] sm:$0xff]  ;;  %v192_v42 = vld [vmem:[%s1964_s1 + $0x158] sm:$0xff] }
  0x79   :  { %v452_v56 = vmax.f32 %v314_v45, 0.0  ;;  %v453_v61 = vmax.f32 %v315_v51, 0.0 }
  0x7e   :  { %v40_v47 = vld [vmem:[%s1963_s0 + $0xe8] sm:$0xff] }
  0x7f   :  { %585 = vst [vmem:[%s1965_s2 + $0xb0] sm:$0xff] %v447_v37  ;;  %586 = vst [vmem:[%s1965_s2 + $0xb8] sm:$0xff] %v448_v38  ;;  %v316_v52 = vadd.f32 %v178_v48, %v40_v47  ;;  %v191_v38 = vld [vmem:[%s1964_s1 + $0x150] sm:$0xff] }
  0x81   :  { %v454_v62 = vmax.f32 %v316_v52, 0.0 }
  0x86   :  { %v41_v53 = vld [vmem:[%s1963_s0 + $0xf0] sm:$0xff]  ;;  %v42_v55 = vld [vmem:[%s1963_s0 + $0xf8] sm:$0xff] }
  0x87   :  { %587 = vst [vmem:[%s1965_s2 + $0xc0] sm:$0xff] %v449_v44  ;;  %v317_v57 = vadd.f32 %v179_v54, %v41_v53  ;;  %v318_v63 = vadd.f32 %v180_v58, %v42_v55  ;;  %v193_v44 = vld [vmem:[%s1964_s1 + $0x160] sm:$0xff]  ;;  %v195_v54 = vld [vmem:[%s1964_s1 + $0x170] sm:$0xff] }
  0x89   :  { %v455_v4 = vmax.f32 %v317_v57, 0.0  ;;  %v456_v9 = vmax.f32 %v318_v63, 0.0 }
  0x8e   :  { %v43_v59 = vld [vmem:[%s1963_s0 + $0x100] sm:$0xff] }
  0x8f   :  { %588 = vst [vmem:[%s1965_s2 + $0xc8] sm:$0xff] %v450_v49  ;;  %589 = vst [vmem:[%s1965_s2 + $0xd0] sm:$0xff] %v451_v50  ;;  %v319_v0 = vadd.f32 %v181_v60, %v43_v59  ;;  %v194_v50 = vld [vmem:[%s1964_s1 + $0x168] sm:$0xff] }
  0x91   :  { %v457_v10 = vmax.f32 %v319_v0, 0.0 }
  0x96   :  { %v44_v1 = vld [vmem:[%s1963_s0 + $0x108] sm:$0xff]  ;;  %v45_v3 = vld [vmem:[%s1963_s0 + $0x110] sm:$0xff] }
  0x97   :  { %590 = vst [vmem:[%s1965_s2 + $0xd8] sm:$0xff] %v452_v56  ;;  %v320_v5 = vadd.f32 %v182_v2, %v44_v1  ;;  %v321_v11 = vadd.f32 %v183_v6, %v45_v3  ;;  %v196_v56 = vld [vmem:[%s1964_s1 + $0x178] sm:$0xff]  ;;  %v198_v2 = vld [vmem:[%s1964_s1 + $0x188] sm:$0xff] }
  0x99   :  { %v458_v16 = vmax.f32 %v320_v5, 0.0  ;;  %v459_v21 = vmax.f32 %v321_v11, 0.0 }
  0x9e   :  { %v46_v7 = vld [vmem:[%s1963_s0 + $0x118] sm:$0xff] }
  0x9f   :  { %591 = vst [vmem:[%s1965_s2 + $0xe0] sm:$0xff] %v453_v61  ;;  %592 = vst [vmem:[%s1965_s2 + $0xe8] sm:$0xff] %v454_v62  ;;  %v322_v12 = vadd.f32 %v184_v8, %v46_v7  ;;  %v197_v62 = vld [vmem:[%s1964_s1 + $0x180] sm:$0xff] }
  0xa1   :  { %v460_v22 = vmax.f32 %v322_v12, 0.0 }
  0xa6   :  { %v47_v13 = vld [vmem:[%s1963_s0 + $0x120] sm:$0xff]  ;;  %v48_v15 = vld [vmem:[%s1963_s0 + $0x128] sm:$0xff] }
  0xa7   :  { %593 = vst [vmem:[%s1965_s2 + $0xf0] sm:$0xff] %v455_v4  ;;  %v323_v17 = vadd.f32 %v185_v14, %v47_v13  ;;  %v324_v23 = vadd.f32 %v186_v18, %v48_v15  ;;  %v199_v4 = vld [vmem:[%s1964_s1 + $0x190] sm:$0xff]  ;;  %v201_v14 = vld [vmem:[%s1964_s1 + $0x1a0] sm:$0xff] }
  0xa9   :  { %v461_v28 = vmax.f32 %v323_v17, 0.0  ;;  %v462_v33 = vmax.f32 %v324_v23, 0.0 }
  0xae   :  { %v49_v19 = vld [vmem:[%s1963_s0 + $0x130] sm:$0xff] }
  0xaf   :  { %594 = vst [vmem:[%s1965_s2 + $0xf8] sm:$0xff] %v456_v9  ;;  %595 = vst [vmem:[%s1965_s2 + $0x100] sm:$0xff] %v457_v10  ;;  %v325_v24 = vadd.f32 %v187_v20, %v49_v19  ;;  %v200_v10 = vld [vmem:[%s1964_s1 + $0x198] sm:$0xff] }
  0xb1   :  { %v463_v34 = vmax.f32 %v325_v24, 0.0 }
  0xb6   :  { %v50_v25 = vld [vmem:[%s1963_s0 + $0x138] sm:$0xff]  ;;  %v51_v27 = vld [vmem:[%s1963_s0 + $0x140] sm:$0xff] }
  0xb7   :  { %596 = vst [vmem:[%s1965_s2 + $0x108] sm:$0xff] %v458_v16  ;;  %v326_v29 = vadd.f32 %v188_v26, %v50_v25  ;;  %v327_v35 = vadd.f32 %v189_v30, %v51_v27  ;;  %v202_v16 = vld [vmem:[%s1964_s1 + $0x1a8] sm:$0xff]  ;;  %v204_v26 = vld [vmem:[%s1964_s1 + $0x1b8] sm:$0xff] }
  0xb9   :  { %v464_v40 = vmax.f32 %v326_v29, 0.0  ;;  %v465_v45 = vmax.f32 %v327_v35, 0.0 }
  0xbe   :  { %v52_v31 = vld [vmem:[%s1963_s0 + $0x148] sm:$0xff] }
  0xbf   :  { %597 = vst [vmem:[%s1965_s2 + $0x110] sm:$0xff] %v459_v21  ;;  %598 = vst [vmem:[%s1965_s2 + $0x118] sm:$0xff] %v460_v22  ;;  %v328_v36 = vadd.f32 %v190_v32, %v52_v31  ;;  %v203_v22 = vld [vmem:[%s1964_s1 + $0x1b0] sm:$0xff] }
  0xc1   :  { %v466_v46 = vmax.f32 %v328_v36, 0.0 }
  0xc6   :  { %v53_v37 = vld [vmem:[%s1963_s0 + $0x150] sm:$0xff]  ;;  %v54_v39 = vld [vmem:[%s1963_s0 + $0x158] sm:$0xff] }
  0xc7   :  { %599 = vst [vmem:[%s1965_s2 + $0x120] sm:$0xff] %v461_v28  ;;  %v329_v41 = vadd.f32 %v191_v38, %v53_v37  ;;  %v330_v47 = vadd.f32 %v192_v42, %v54_v39  ;;  %v205_v28 = vld [vmem:[%s1964_s1 + $0x1c0] sm:$0xff]  ;;  %v207_v38 = vld [vmem:[%s1964_s1 + $0x1d0] sm:$0xff] }
  0xc9   :  { %v467_v52 = vmax.f32 %v329_v41, 0.0  ;;  %v468_v57 = vmax.f32 %v330_v47, 0.0 }
  0xce   :  { %v55_v43 = vld [vmem:[%s1963_s0 + $0x160] sm:$0xff] }
  0xcf   :  { %600 = vst [vmem:[%s1965_s2 + $0x128] sm:$0xff] %v462_v33  ;;  %601 = vst [vmem:[%s1965_s2 + $0x130] sm:$0xff] %v463_v34  ;;  %v331_v48 = vadd.f32 %v193_v44, %v55_v43  ;;  %v206_v34 = vld [vmem:[%s1964_s1 + $0x1c8] sm:$0xff] }
  0xd1   :  { %v469_v58 = vmax.f32 %v331_v48, 0.0 }
  0xd6   :  { %v56_v49 = vld [vmem:[%s1963_s0 + $0x168] sm:$0xff]  ;;  %v57_v51 = vld [vmem:[%s1963_s0 + $0x170] sm:$0xff] }
  0xd7   :  { %602 = vst [vmem:[%s1965_s2 + $0x138] sm:$0xff] %v464_v40  ;;  %v332_v53 = vadd.f32 %v194_v50, %v56_v49  ;;  %v333_v59 = vadd.f32 %v195_v54, %v57_v51  ;;  %v208_v40 = vld [vmem:[%s1964_s1 + $0x1d8] sm:$0xff]  ;;  %v210_v50 = vld [vmem:[%s1964_s1 + $0x1e8] sm:$0xff] }
  0xd9   :  { %v470_v0 = vmax.f32 %v332_v53, 0.0  ;;  %v471_v5 = vmax.f32 %v333_v59, 0.0 }
  0xde   :  { %v58_v55 = vld [vmem:[%s1963_s0 + $0x178] sm:$0xff] }
  0xdf   :  { %603 = vst [vmem:[%s1965_s2 + $0x140] sm:$0xff] %v465_v45  ;;  %604 = vst [vmem:[%s1965_s2 + $0x148] sm:$0xff] %v466_v46  ;;  %v334_v60 = vadd.f32 %v196_v56, %v58_v55  ;;  %v209_v46 = vld [vmem:[%s1964_s1 + $0x1e0] sm:$0xff] }
  0xe1   :  { %v472_v6 = vmax.f32 %v334_v60, 0.0 }
  0xe6   :  { %v59_v61 = vld [vmem:[%s1963_s0 + $0x180] sm:$0xff]  ;;  %v60_v63 = vld [vmem:[%s1963_s0 + $0x188] sm:$0xff] }
  0xe7   :  { %605 = vst [vmem:[%s1965_s2 + $0x150] sm:$0xff] %v467_v52  ;;  %v335_v1 = vadd.f32 %v197_v62, %v59_v61  ;;  %v336_v7 = vadd.f32 %v198_v2, %v60_v63  ;;  %v211_v52 = vld [vmem:[%s1964_s1 + $0x1f0] sm:$0xff]  ;;  %v213_v62 = vld [vmem:[%s1964_s1 + $0x200] sm:$0xff] }
  0xe9   :  { %v473_v12 = vmax.f32 %v335_v1, 0.0  ;;  %v474_v17 = vmax.f32 %v336_v7, 0.0 }
  0xee   :  { %v61_v3 = vld [vmem:[%s1963_s0 + $0x190] sm:$0xff] }
  0xef   :  { %606 = vst [vmem:[%s1965_s2 + $0x158] sm:$0xff] %v468_v57  ;;  %607 = vst [vmem:[%s1965_s2 + $0x160] sm:$0xff] %v469_v58  ;;  %v337_v8 = vadd.f32 %v199_v4, %v61_v3  ;;  %v212_v58 = vld [vmem:[%s1964_s1 + $0x1f8] sm:$0xff] }
  0xf1   :  { %v475_v18 = vmax.f32 %v337_v8, 0.0 }
  0xf6   :  { %v62_v9 = vld [vmem:[%s1963_s0 + $0x198] sm:$0xff]  ;;  %v63_v11 = vld [vmem:[%s1963_s0 + $0x1a0] sm:$0xff] }
  0xf7   :  { %608 = vst [vmem:[%s1965_s2 + $0x168] sm:$0xff] %v470_v0  ;;  %v338_v13 = vadd.f32 %v200_v10, %v62_v9  ;;  %v339_v19 = vadd.f32 %v201_v14, %v63_v11  ;;  %v214_v0 = vld [vmem:[%s1964_s1 + $0x208] sm:$0xff]  ;;  %v216_v10 = vld [vmem:[%s1964_s1 + $0x218] sm:$0xff] }
  0xf9   :  { %v476_v24 = vmax.f32 %v338_v13, 0.0  ;;  %v477_v29 = vmax.f32 %v339_v19, 0.0 }
  0xfe   :  { %v64_v15 = vld [vmem:[%s1963_s0 + $0x1a8] sm:$0xff] }
  0xff   :  { %609 = vst [vmem:[%s1965_s2 + $0x170] sm:$0xff] %v471_v5  ;;  %610 = vst [vmem:[%s1965_s2 + $0x178] sm:$0xff] %v472_v6  ;;  %v340_v20 = vadd.f32 %v202_v16, %v64_v15  ;;  %v215_v6 = vld [vmem:[%s1964_s1 + $0x210] sm:$0xff] }
 0x101   :  { %v478_v30 = vmax.f32 %v340_v20, 0.0 }
 0x106   :  { %v65_v21 = vld [vmem:[%s1963_s0 + $0x1b0] sm:$0xff]  ;;  %v66_v23 = vld [vmem:[%s1963_s0 + $0x1b8] sm:$0xff] }
 0x107   :  { %611 = vst [vmem:[%s1965_s2 + $0x180] sm:$0xff] %v473_v12  ;;  %v341_v25 = vadd.f32 %v203_v22, %v65_v21  ;;  %v342_v31 = vadd.f32 %v204_v26, %v66_v23  ;;  %v217_v12 = vld [vmem:[%s1964_s1 + $0x220] sm:$0xff]  ;;  %v219_v22 = vld [vmem:[%s1964_s1 + $0x230] sm:$0xff] }
 0x109   :  { %v479_v36 = vmax.f32 %v341_v25, 0.0  ;;  %v480_v41 = vmax.f32 %v342_v31, 0.0 }
 0x10e   :  { %v67_v27 = vld [vmem:[%s1963_s0 + $0x1c0] sm:$0xff] }
 0x10f   :  { %612 = vst [vmem:[%s1965_s2 + $0x188] sm:$0xff] %v474_v17  ;;  %613 = vst [vmem:[%s1965_s2 + $0x190] sm:$0xff] %v475_v18  ;;  %v343_v32 = vadd.f32 %v205_v28, %v67_v27  ;;  %v218_v18 = vld [vmem:[%s1964_s1 + $0x228] sm:$0xff] }
 0x111   :  { %v481_v42 = vmax.f32 %v343_v32, 0.0 }
 0x116   :  { %v68_v33 = vld [vmem:[%s1963_s0 + $0x1c8] sm:$0xff]  ;;  %v69_v35 = vld [vmem:[%s1963_s0 + $0x1d0] sm:$0xff] }
 0x117   :  { %614 = vst [vmem:[%s1965_s2 + $0x198] sm:$0xff] %v476_v24  ;;  %v344_v37 = vadd.f32 %v206_v34, %v68_v33  ;;  %v345_v43 = vadd.f32 %v207_v38, %v69_v35  ;;  %v220_v24 = vld [vmem:[%s1964_s1 + $0x238] sm:$0xff]  ;;  %v222_v34 = vld [vmem:[%s1964_s1 + $0x248] sm:$0xff] }
 0x119   :  { %v482_v48 = vmax.f32 %v344_v37, 0.0  ;;  %v483_v53 = vmax.f32 %v345_v43, 0.0 }
 0x11e   :  { %v70_v39 = vld [vmem:[%s1963_s0 + $0x1d8] sm:$0xff] }
 0x11f   :  { %615 = vst [vmem:[%s1965_s2 + $0x1a0] sm:$0xff] %v477_v29  ;;  %616 = vst [vmem:[%s1965_s2 + $0x1a8] sm:$0xff] %v478_v30  ;;  %v346_v44 = vadd.f32 %v208_v40, %v70_v39  ;;  %v221_v30 = vld [vmem:[%s1964_s1 + $0x240] sm:$0xff] }
 0x121   :  { %v484_v54 = vmax.f32 %v346_v44, 0.0 }
 0x126   :  { %v71_v45 = vld [vmem:[%s1963_s0 + $0x1e0] sm:$0xff]  ;;  %v72_v47 = vld [vmem:[%s1963_s0 + $0x1e8] sm:$0xff] }
 0x127   :  { %617 = vst [vmem:[%s1965_s2 + $0x1b0] sm:$0xff] %v479_v36  ;;  %v347_v49 = vadd.f32 %v209_v46, %v71_v45  ;;  %v348_v55 = vadd.f32 %v210_v50, %v72_v47  ;;  %v223_v36 = vld [vmem:[%s1964_s1 + $0x250] sm:$0xff]  ;;  %v225_v46 = vld [vmem:[%s1964_s1 + $0x260] sm:$0xff] }
 0x129   :  { %v485_v60 = vmax.f32 %v347_v49, 0.0  ;;  %v486_v1 = vmax.f32 %v348_v55, 0.0 }
 0x12e   :  { %v73_v51 = vld [vmem:[%s1963_s0 + $0x1f0] sm:$0xff] }
 0x12f   :  { %618 = vst [vmem:[%s1965_s2 + $0x1b8] sm:$0xff] %v480_v41  ;;  %619 = vst [vmem:[%s1965_s2 + $0x1c0] sm:$0xff] %v481_v42  ;;  %v349_v56 = vadd.f32 %v211_v52, %v73_v51  ;;  %v224_v42 = vld [vmem:[%s1964_s1 + $0x258] sm:$0xff] }
 0x131   :  { %v487_v2 = vmax.f32 %v349_v56, 0.0 }
 0x136   :  { %v74_v57 = vld [vmem:[%s1963_s0 + $0x1f8] sm:$0xff]  ;;  %v75_v59 = vld [vmem:[%s1963_s0 + $0x200] sm:$0xff] }
 0x137   :  { %620 = vst [vmem:[%s1965_s2 + $0x1c8] sm:$0xff] %v482_v48  ;;  %v350_v61 = vadd.f32 %v212_v58, %v74_v57  ;;  %v351_v3 = vadd.f32 %v213_v62, %v75_v59  ;;  %v226_v48 = vld [vmem:[%s1964_s1 + $0x268] sm:$0xff]  ;;  %v228_v58 = vld [vmem:[%s1964_s1 + $0x278] sm:$0xff] }
 0x139   :  { %v488_v8 = vmax.f32 %v350_v61, 0.0  ;;  %v489_v13 = vmax.f32 %v351_v3, 0.0 }
 0x13e   :  { %v76_v63 = vld [vmem:[%s1963_s0 + $0x208] sm:$0xff] }
 0x13f   :  { %621 = vst [vmem:[%s1965_s2 + $0x1d0] sm:$0xff] %v483_v53  ;;  %622 = vst [vmem:[%s1965_s2 + $0x1d8] sm:$0xff] %v484_v54  ;;  %v352_v4 = vadd.f32 %v214_v0, %v76_v63  ;;  %v227_v54 = vld [vmem:[%s1964_s1 + $0x270] sm:$0xff] }
 0x141   :  { %v490_v14 = vmax.f32 %v352_v4, 0.0 }
 0x146   :  { %v77_v5 = vld [vmem:[%s1963_s0 + $0x210] sm:$0xff]  ;;  %v78_v7 = vld [vmem:[%s1963_s0 + $0x218] sm:$0xff] }
 0x147   :  { %623 = vst [vmem:[%s1965_s2 + $0x1e0] sm:$0xff] %v485_v60  ;;  %v353_v9 = vadd.f32 %v215_v6, %v77_v5  ;;  %v354_v15 = vadd.f32 %v216_v10, %v78_v7  ;;  %v229_v60 = vld [vmem:[%s1964_s1 + $0x280] sm:$0xff]  ;;  %v231_v6 = vld [vmem:[%s1964_s1 + $0x290] sm:$0xff] }
 0x149   :  { %v491_v20 = vmax.f32 %v353_v9, 0.0  ;;  %v492_v25 = vmax.f32 %v354_v15, 0.0 }
 0x14e   :  { %v79_v11 = vld [vmem:[%s1963_s0 + $0x220] sm:$0xff] }
 0x14f   :  { %624 = vst [vmem:[%s1965_s2 + $0x1e8] sm:$0xff] %v486_v1  ;;  %625 = vst [vmem:[%s1965_s2 + $0x1f0] sm:$0xff] %v487_v2  ;;  %v355_v16 = vadd.f32 %v217_v12, %v79_v11  ;;  %v230_v2 = vld [vmem:[%s1964_s1 + $0x288] sm:$0xff] }
 0x151   :  { %v493_v26 = vmax.f32 %v355_v16, 0.0 }
 0x156   :  { %v80_v17 = vld [vmem:[%s1963_s0 + $0x228] sm:$0xff]  ;;  %v81_v19 = vld [vmem:[%s1963_s0 + $0x230] sm:$0xff] }
 0x157   :  { %626 = vst [vmem:[%s1965_s2 + $0x1f8] sm:$0xff] %v488_v8  ;;  %v356_v21 = vadd.f32 %v218_v18, %v80_v17  ;;  %v357_v27 = vadd.f32 %v219_v22, %v81_v19  ;;  %v232_v8 = vld [vmem:[%s1964_s1 + $0x298] sm:$0xff]  ;;  %v234_v18 = vld [vmem:[%s1964_s1 + $0x2a8] sm:$0xff] }
 0x159   :  { %v494_v32 = vmax.f32 %v356_v21, 0.0  ;;  %v495_v37 = vmax.f32 %v357_v27, 0.0 }
 0x15e   :  { %v82_v23 = vld [vmem:[%s1963_s0 + $0x238] sm:$0xff] }
 0x15f   :  { %627 = vst [vmem:[%s1965_s2 + $0x200] sm:$0xff] %v489_v13  ;;  %628 = vst [vmem:[%s1965_s2 + $0x208] sm:$0xff] %v490_v14  ;;  %v358_v28 = vadd.f32 %v220_v24, %v82_v23  ;;  %v233_v14 = vld [vmem:[%s1964_s1 + $0x2a0] sm:$0xff] }
 0x161   :  { %v496_v38 = vmax.f32 %v358_v28, 0.0 }
 0x166   :  { %v83_v29 = vld [vmem:[%s1963_s0 + $0x240] sm:$0xff]  ;;  %v84_v31 = vld [vmem:[%s1963_s0 + $0x248] sm:$0xff] }
 0x167   :  { %629 = vst [vmem:[%s1965_s2 + $0x210] sm:$0xff] %v491_v20  ;;  %v359_v33 = vadd.f32 %v221_v30, %v83_v29  ;;  %v360_v39 = vadd.f32 %v222_v34, %v84_v31  ;;  %v235_v20 = vld [vmem:[%s1964_s1 + $0x2b0] sm:$0xff]  ;;  %v237_v30 = vld [vmem:[%s1964_s1 + $0x2c0] sm:$0xff] }
 0x169   :  { %v497_v44 = vmax.f32 %v359_v33, 0.0  ;;  %v498_v49 = vmax.f32 %v360_v39, 0.0 }
 0x16e   :  { %v85_v35 = vld [vmem:[%s1963_s0 + $0x250] sm:$0xff] }
 0x16f   :  { %630 = vst [vmem:[%s1965_s2 + $0x218] sm:$0xff] %v492_v25  ;;  %631 = vst [vmem:[%s1965_s2 + $0x220] sm:$0xff] %v493_v26  ;;  %v361_v40 = vadd.f32 %v223_v36, %v85_v35  ;;  %v236_v26 = vld [vmem:[%s1964_s1 + $0x2b8] sm:$0xff] }
 0x171   :  { %v499_v50 = vmax.f32 %v361_v40, 0.0 }
 0x176   :  { %v86_v41 = vld [vmem:[%s1963_s0 + $0x258] sm:$0xff]  ;;  %v87_v43 = vld [vmem:[%s1963_s0 + $0x260] sm:$0xff] }
 0x177   :  { %632 = vst [vmem:[%s1965_s2 + $0x228] sm:$0xff] %v494_v32  ;;  %v362_v45 = vadd.f32 %v224_v42, %v86_v41  ;;  %v363_v51 = vadd.f32 %v225_v46, %v87_v43  ;;  %v238_v32 = vld [vmem:[%s1964_s1 + $0x2c8] sm:$0xff]  ;;  %v240_v42 = vld [vmem:[%s1964_s1 + $0x2d8] sm:$0xff] }
 0x179   :  { %v500_v56 = vmax.f32 %v362_v45, 0.0  ;;  %v501_v61 = vmax.f32 %v363_v51, 0.0 }
 0x17e   :  { %v88_v47 = vld [vmem:[%s1963_s0 + $0x268] sm:$0xff] }
 0x17f   :  { %633 = vst [vmem:[%s1965_s2 + $0x230] sm:$0xff] %v495_v37  ;;  %634 = vst [vmem:[%s1965_s2 + $0x238] sm:$0xff] %v496_v38  ;;  %v364_v52 = vadd.f32 %v226_v48, %v88_v47  ;;  %v239_v38 = vld [vmem:[%s1964_s1 + $0x2d0] sm:$0xff] }
 0x181   :  { %v502_v62 = vmax.f32 %v364_v52, 0.0 }
 0x186   :  { %v89_v53 = vld [vmem:[%s1963_s0 + $0x270] sm:$0xff]  ;;  %v90_v55 = vld [vmem:[%s1963_s0 + $0x278] sm:$0xff] }
 0x187   :  { %635 = vst [vmem:[%s1965_s2 + $0x240] sm:$0xff] %v497_v44  ;;  %v365_v57 = vadd.f32 %v227_v54, %v89_v53  ;;  %v366_v63 = vadd.f32 %v228_v58, %v90_v55  ;;  %v241_v44 = vld [vmem:[%s1964_s1 + $0x2e0] sm:$0xff]  ;;  %v243_v54 = vld [vmem:[%s1964_s1 + $0x2f0] sm:$0xff] }
 0x189   :  { %v503_v4 = vmax.f32 %v365_v57, 0.0  ;;  %v504_v9 = vmax.f32 %v366_v63, 0.0 }
 0x18e   :  { %v91_v59 = vld [vmem:[%s1963_s0 + $0x280] sm:$0xff] }
 0x18f   :  { %636 = vst [vmem:[%s1965_s2 + $0x248] sm:$0xff] %v498_v49  ;;  %637 = vst [vmem:[%s1965_s2 + $0x250] sm:$0xff] %v499_v50  ;;  %v367_v0 = vadd.f32 %v229_v60, %v91_v59  ;;  %v242_v50 = vld [vmem:[%s1964_s1 + $0x2e8] sm:$0xff] }
 0x191   :  { %v505_v10 = vmax.f32 %v367_v0, 0.0 }
 0x196   :  { %v92_v1 = vld [vmem:[%s1963_s0 + $0x288] sm:$0xff]  ;;  %v93_v3 = vld [vmem:[%s1963_s0 + $0x290] sm:$0xff] }
 0x197   :  { %638 = vst [vmem:[%s1965_s2 + $0x258] sm:$0xff] %v500_v56  ;;  %v368_v5 = vadd.f32 %v230_v2, %v92_v1  ;;  %v369_v11 = vadd.f32 %v231_v6, %v93_v3  ;;  %v244_v56 = vld [vmem:[%s1964_s1 + $0x2f8] sm:$0xff]  ;;  %v246_v2 = vld [vmem:[%s1964_s1 + $0x308] sm:$0xff] }
 0x199   :  { %v506_v16 = vmax.f32 %v368_v5, 0.0  ;;  %v507_v21 = vmax.f32 %v369_v11, 0.0 }
 0x19e   :  { %v94_v7 = vld [vmem:[%s1963_s0 + $0x298] sm:$0xff] }
 0x19f   :  { %639 = vst [vmem:[%s1965_s2 + $0x260] sm:$0xff] %v501_v61  ;;  %640 = vst [vmem:[%s1965_s2 + $0x268] sm:$0xff] %v502_v62  ;;  %v370_v12 = vadd.f32 %v232_v8, %v94_v7  ;;  %v245_v62 = vld [vmem:[%s1964_s1 + $0x300] sm:$0xff] }
 0x1a1   :  { %v508_v22 = vmax.f32 %v370_v12, 0.0 }
 0x1a6   :  { %v95_v13 = vld [vmem:[%s1963_s0 + $0x2a0] sm:$0xff]  ;;  %v96_v15 = vld [vmem:[%s1963_s0 + $0x2a8] sm:$0xff] }
 0x1a7   :  { %641 = vst [vmem:[%s1965_s2 + $0x270] sm:$0xff] %v503_v4  ;;  %v371_v17 = vadd.f32 %v233_v14, %v95_v13  ;;  %v372_v23 = vadd.f32 %v234_v18, %v96_v15  ;;  %v247_v4 = vld [vmem:[%s1964_s1 + $0x310] sm:$0xff]  ;;  %v249_v14 = vld [vmem:[%s1964_s1 + $0x320] sm:$0xff] }
 0x1a9   :  { %v509_v28 = vmax.f32 %v371_v17, 0.0  ;;  %v510_v33 = vmax.f32 %v372_v23, 0.0 }
 0x1ae   :  { %v97_v19 = vld [vmem:[%s1963_s0 + $0x2b0] sm:$0xff] }
 0x1af   :  { %642 = vst [vmem:[%s1965_s2 + $0x278] sm:$0xff] %v504_v9  ;;  %643 = vst [vmem:[%s1965_s2 + $0x280] sm:$0xff] %v505_v10  ;;  %v373_v24 = vadd.f32 %v235_v20, %v97_v19  ;;  %v248_v10 = vld [vmem:[%s1964_s1 + $0x318] sm:$0xff] }
 0x1b1   :  { %v511_v34 = vmax.f32 %v373_v24, 0.0 }
 0x1b6   :  { %v98_v25 = vld [vmem:[%s1963_s0 + $0x2b8] sm:$0xff]  ;;  %v99_v27 = vld [vmem:[%s1963_s0 + $0x2c0] sm:$0xff] }
 0x1b7   :  { %644 = vst [vmem:[%s1965_s2 + $0x288] sm:$0xff] %v506_v16  ;;  %v374_v29 = vadd.f32 %v236_v26, %v98_v25  ;;  %v375_v35 = vadd.f32 %v237_v30, %v99_v27  ;;  %v250_v16 = vld [vmem:[%s1964_s1 + $0x328] sm:$0xff]  ;;  %v252_v26 = vld [vmem:[%s1964_s1 + $0x338] sm:$0xff] }
 0x1b9   :  { %v512_v40 = vmax.f32 %v374_v29, 0.0  ;;  %v513_v45 = vmax.f32 %v375_v35, 0.0 }
 0x1be   :  { %v100_v31 = vld [vmem:[%s1963_s0 + $0x2c8] sm:$0xff] }
 0x1bf   :  { %645 = vst [vmem:[%s1965_s2 + $0x290] sm:$0xff] %v507_v21  ;;  %646 = vst [vmem:[%s1965_s2 + $0x298] sm:$0xff] %v508_v22  ;;  %v376_v36 = vadd.f32 %v238_v32, %v100_v31  ;;  %v251_v22 = vld [vmem:[%s1964_s1 + $0x330] sm:$0xff] }
 0x1c1   :  { %v514_v46 = vmax.f32 %v376_v36, 0.0 }
 0x1c6   :  { %v101_v37 = vld [vmem:[%s1963_s0 + $0x2d0] sm:$0xff]  ;;  %v102_v39 = vld [vmem:[%s1963_s0 + $0x2d8] sm:$0xff] }
 0x1c7   :  { %647 = vst [vmem:[%s1965_s2 + $0x2a0] sm:$0xff] %v509_v28  ;;  %v377_v41 = vadd.f32 %v239_v38, %v101_v37  ;;  %v378_v47 = vadd.f32 %v240_v42, %v102_v39  ;;  %v253_v28 = vld [vmem:[%s1964_s1 + $0x340] sm:$0xff]  ;;  %v255_v38 = vld [vmem:[%s1964_s1 + $0x350] sm:$0xff] }
 0x1c9   :  { %v515_v52 = vmax.f32 %v377_v41, 0.0  ;;  %v516_v57 = vmax.f32 %v378_v47, 0.0 }
 0x1ce   :  { %v103_v43 = vld [vmem:[%s1963_s0 + $0x2e0] sm:$0xff] }
 0x1cf   :  { %648 = vst [vmem:[%s1965_s2 + $0x2a8] sm:$0xff] %v510_v33  ;;  %649 = vst [vmem:[%s1965_s2 + $0x2b0] sm:$0xff] %v511_v34  ;;  %v379_v48 = vadd.f32 %v241_v44, %v103_v43  ;;  %v254_v34 = vld [vmem:[%s1964_s1 + $0x348] sm:$0xff] }
 0x1d1   :  { %v517_v58 = vmax.f32 %v379_v48, 0.0 }
 0x1d6   :  { %v104_v49 = vld [vmem:[%s1963_s0 + $0x2e8] sm:$0xff]  ;;  %v105_v51 = vld [vmem:[%s1963_s0 + $0x2f0] sm:$0xff] }
 0x1d7   :  { %650 = vst [vmem:[%s1965_s2 + $0x2b8] sm:$0xff] %v512_v40  ;;  %v380_v53 = vadd.f32 %v242_v50, %v104_v49  ;;  %v381_v59 = vadd.f32 %v243_v54, %v105_v51  ;;  %v256_v40 = vld [vmem:[%s1964_s1 + $0x358] sm:$0xff]  ;;  %v258_v50 = vld [vmem:[%s1964_s1 + $0x368] sm:$0xff] }
 0x1d9   :  { %v518_v0 = vmax.f32 %v380_v53, 0.0  ;;  %v519_v5 = vmax.f32 %v381_v59, 0.0 }
 0x1de   :  { %v106_v55 = vld [vmem:[%s1963_s0 + $0x2f8] sm:$0xff] }
 0x1df   :  { %651 = vst [vmem:[%s1965_s2 + $0x2c0] sm:$0xff] %v513_v45  ;;  %652 = vst [vmem:[%s1965_s2 + $0x2c8] sm:$0xff] %v514_v46  ;;  %v382_v60 = vadd.f32 %v244_v56, %v106_v55  ;;  %v257_v46 = vld [vmem:[%s1964_s1 + $0x360] sm:$0xff] }
 0x1e1   :  { %v520_v6 = vmax.f32 %v382_v60, 0.0 }
 0x1e6   :  { %v107_v61 = vld [vmem:[%s1963_s0 + $0x300] sm:$0xff]  ;;  %v108_v63 = vld [vmem:[%s1963_s0 + $0x308] sm:$0xff] }
 0x1e7   :  { %653 = vst [vmem:[%s1965_s2 + $0x2d0] sm:$0xff] %v515_v52  ;;  %v383_v1 = vadd.f32 %v245_v62, %v107_v61  ;;  %v384_v7 = vadd.f32 %v246_v2, %v108_v63  ;;  %v259_v52 = vld [vmem:[%s1964_s1 + $0x370] sm:$0xff]  ;;  %v261_v62 = vld [vmem:[%s1964_s1 + $0x380] sm:$0xff] }
 0x1e9   :  { %v521_v12 = vmax.f32 %v383_v1, 0.0  ;;  %v522_v17 = vmax.f32 %v384_v7, 0.0 }
 0x1ee   :  { %v109_v3 = vld [vmem:[%s1963_s0 + $0x310] sm:$0xff] }
 0x1ef   :  { %654 = vst [vmem:[%s1965_s2 + $0x2d8] sm:$0xff] %v516_v57  ;;  %655 = vst [vmem:[%s1965_s2 + $0x2e0] sm:$0xff] %v517_v58  ;;  %v385_v8 = vadd.f32 %v247_v4, %v109_v3  ;;  %v260_v58 = vld [vmem:[%s1964_s1 + $0x378] sm:$0xff] }
 0x1f1   :  { %v523_v18 = vmax.f32 %v385_v8, 0.0 }
 0x1f6   :  { %v110_v9 = vld [vmem:[%s1963_s0 + $0x318] sm:$0xff]  ;;  %v111_v11 = vld [vmem:[%s1963_s0 + $0x320] sm:$0xff] }
 0x1f7   :  { %656 = vst [vmem:[%s1965_s2 + $0x2e8] sm:$0xff] %v518_v0  ;;  %v386_v13 = vadd.f32 %v248_v10, %v110_v9  ;;  %v387_v19 = vadd.f32 %v249_v14, %v111_v11  ;;  %v262_v0 = vld [vmem:[%s1964_s1 + $0x388] sm:$0xff]  ;;  %v264_v10 = vld [vmem:[%s1964_s1 + $0x398] sm:$0xff] }
 0x1f9   :  { %v524_v24 = vmax.f32 %v386_v13, 0.0  ;;  %v525_v29 = vmax.f32 %v387_v19, 0.0 }
 0x1fe   :  { %v112_v15 = vld [vmem:[%s1963_s0 + $0x328] sm:$0xff] }
 0x1ff   :  { %657 = vst [vmem:[%s1965_s2 + $0x2f0] sm:$0xff] %v519_v5  ;;  %658 = vst [vmem:[%s1965_s2 + $0x2f8] sm:$0xff] %v520_v6  ;;  %v388_v20 = vadd.f32 %v250_v16, %v112_v15  ;;  %v263_v6 = vld [vmem:[%s1964_s1 + $0x390] sm:$0xff] }
 0x201   :  { %v526_v30 = vmax.f32 %v388_v20, 0.0 }
 0x206   :  { %v113_v21 = vld [vmem:[%s1963_s0 + $0x330] sm:$0xff]  ;;  %v114_v23 = vld [vmem:[%s1963_s0 + $0x338] sm:$0xff] }
 0x207   :  { %659 = vst [vmem:[%s1965_s2 + $0x300] sm:$0xff] %v521_v12  ;;  %v389_v25 = vadd.f32 %v251_v22, %v113_v21  ;;  %v390_v31 = vadd.f32 %v252_v26, %v114_v23  ;;  %v265_v12 = vld [vmem:[%s1964_s1 + $0x3a0] sm:$0xff]  ;;  %v267_v22 = vld [vmem:[%s1964_s1 + $0x3b0] sm:$0xff] }
 0x209   :  { %v527_v36 = vmax.f32 %v389_v25, 0.0  ;;  %v528_v41 = vmax.f32 %v390_v31, 0.0 }
 0x20e   :  { %v115_v27 = vld [vmem:[%s1963_s0 + $0x340] sm:$0xff] }
 0x20f   :  { %660 = vst [vmem:[%s1965_s2 + $0x308] sm:$0xff] %v522_v17  ;;  %661 = vst [vmem:[%s1965_s2 + $0x310] sm:$0xff] %v523_v18  ;;  %v391_v32 = vadd.f32 %v253_v28, %v115_v27  ;;  %v266_v18 = vld [vmem:[%s1964_s1 + $0x3a8] sm:$0xff] }
 0x211   :  { %v529_v42 = vmax.f32 %v391_v32, 0.0 }
 0x216   :  { %v116_v33 = vld [vmem:[%s1963_s0 + $0x348] sm:$0xff]  ;;  %v117_v35 = vld [vmem:[%s1963_s0 + $0x350] sm:$0xff] }
 0x217   :  { %662 = vst [vmem:[%s1965_s2 + $0x318] sm:$0xff] %v524_v24  ;;  %v392_v37 = vadd.f32 %v254_v34, %v116_v33  ;;  %v393_v43 = vadd.f32 %v255_v38, %v117_v35  ;;  %v268_v24 = vld [vmem:[%s1964_s1 + $0x3b8] sm:$0xff]  ;;  %v270_v34 = vld [vmem:[%s1964_s1 + $0x3c8] sm:$0xff] }
 0x219   :  { %v530_v48 = vmax.f32 %v392_v37, 0.0  ;;  %v531_v53 = vmax.f32 %v393_v43, 0.0 }
 0x21e   :  { %v118_v39 = vld [vmem:[%s1963_s0 + $0x358] sm:$0xff] }
 0x21f   :  { %663 = vst [vmem:[%s1965_s2 + $0x320] sm:$0xff] %v525_v29  ;;  %664 = vst [vmem:[%s1965_s2 + $0x328] sm:$0xff] %v526_v30  ;;  %v394_v44 = vadd.f32 %v256_v40, %v118_v39  ;;  %v269_v30 = vld [vmem:[%s1964_s1 + $0x3c0] sm:$0xff] }
 0x221   :  { %v532_v54 = vmax.f32 %v394_v44, 0.0 }
 0x226   :  { %v119_v45 = vld [vmem:[%s1963_s0 + $0x360] sm:$0xff]  ;;  %v120_v47 = vld [vmem:[%s1963_s0 + $0x368] sm:$0xff] }
 0x227   :  { %665 = vst [vmem:[%s1965_s2 + $0x330] sm:$0xff] %v527_v36  ;;  %v395_v49 = vadd.f32 %v257_v46, %v119_v45  ;;  %v396_v55 = vadd.f32 %v258_v50, %v120_v47  ;;  %v271_v36 = vld [vmem:[%s1964_s1 + $0x3d0] sm:$0xff]  ;;  %v273_v46 = vld [vmem:[%s1964_s1 + $0x3e0] sm:$0xff] }
 0x229   :  { %v533_v60 = vmax.f32 %v395_v49, 0.0  ;;  %v534_v1 = vmax.f32 %v396_v55, 0.0 }
 0x22e   :  { %v121_v51 = vld [vmem:[%s1963_s0 + $0x370] sm:$0xff] }
 0x22f   :  { %666 = vst [vmem:[%s1965_s2 + $0x338] sm:$0xff] %v528_v41  ;;  %667 = vst [vmem:[%s1965_s2 + $0x340] sm:$0xff] %v529_v42  ;;  %v397_v56 = vadd.f32 %v259_v52, %v121_v51  ;;  %v272_v42 = vld [vmem:[%s1964_s1 + $0x3d8] sm:$0xff] }
 0x231   :  { %v535_v2 = vmax.f32 %v397_v56, 0.0 }
 0x236   :  { %v122_v57 = vld [vmem:[%s1963_s0 + $0x378] sm:$0xff]  ;;  %v123_v59 = vld [vmem:[%s1963_s0 + $0x380] sm:$0xff] }
 0x237   :  { %668 = vst [vmem:[%s1965_s2 + $0x348] sm:$0xff] %v530_v48  ;;  %v398_v61 = vadd.f32 %v260_v58, %v122_v57  ;;  %v399_v3 = vadd.f32 %v261_v62, %v123_v59  ;;  %v274_v48 = vld [vmem:[%s1964_s1 + $0x3e8] sm:$0xff]  ;;  %v276_v58 = vld [vmem:[%s1964_s1 + $0x3f8] sm:$0xff] }
 0x239   :  { %v536_v8 = vmax.f32 %v398_v61, 0.0  ;;  %v537_v13 = vmax.f32 %v399_v3, 0.0 }
 0x23e   :  { %v124_v63 = vld [vmem:[%s1963_s0 + $0x388] sm:$0xff] }
 0x23f   :  { %669 = vst [vmem:[%s1965_s2 + $0x350] sm:$0xff] %v531_v53  ;;  %670 = vst [vmem:[%s1965_s2 + $0x358] sm:$0xff] %v532_v54  ;;  %v400_v4 = vadd.f32 %v262_v0, %v124_v63  ;;  %v275_v54 = vld [vmem:[%s1964_s1 + $0x3f0] sm:$0xff] }
 0x241   :  { %v538_v14 = vmax.f32 %v400_v4, 0.0 }
 0x246   :  { %v125_v5 = vld [vmem:[%s1963_s0 + $0x390] sm:$0xff]  ;;  %v126_v7 = vld [vmem:[%s1963_s0 + $0x398] sm:$0xff] }
 0x247   :  { %671 = vst [vmem:[%s1965_s2 + $0x360] sm:$0xff] %v533_v60  ;;  %v401_v9 = vadd.f32 %v263_v6, %v125_v5  ;;  %v402_v15 = vadd.f32 %v264_v10, %v126_v7  ;;  %v277_v60 = vld [vmem:[%s1964_s1 + $0x400] sm:$0xff]  ;;  %v279_v6 = vld [vmem:[%s1964_s1 + $0x410] sm:$0xff] }
 0x249   :  { %v539_v20 = vmax.f32 %v401_v9, 0.0  ;;  %v540_v25 = vmax.f32 %v402_v15, 0.0 }
 0x24e   :  { %v127_v11 = vld [vmem:[%s1963_s0 + $0x3a0] sm:$0xff] }
 0x24f   :  { %672 = vst [vmem:[%s1965_s2 + $0x368] sm:$0xff] %v534_v1  ;;  %673 = vst [vmem:[%s1965_s2 + $0x370] sm:$0xff] %v535_v2  ;;  %v403_v16 = vadd.f32 %v265_v12, %v127_v11  ;;  %v278_v2 = vld [vmem:[%s1964_s1 + $0x408] sm:$0xff] }
 0x251   :  { %v541_v26 = vmax.f32 %v403_v16, 0.0 }
 0x256   :  { %v128_v17 = vld [vmem:[%s1963_s0 + $0x3a8] sm:$0xff]  ;;  %v129_v19 = vld [vmem:[%s1963_s0 + $0x3b0] sm:$0xff] }
 0x257   :  { %674 = vst [vmem:[%s1965_s2 + $0x378] sm:$0xff] %v536_v8  ;;  %v404_v21 = vadd.f32 %v266_v18, %v128_v17  ;;  %v405_v27 = vadd.f32 %v267_v22, %v129_v19  ;;  %v280_v8 = vld [vmem:[%s1964_s1 + $0x418] sm:$0xff]  ;;  %v282_v18 = vld [vmem:[%s1964_s1 + $0x428] sm:$0xff] }
 0x259   :  { %v542_v32 = vmax.f32 %v404_v21, 0.0  ;;  %v543_v37 = vmax.f32 %v405_v27, 0.0 }
 0x25e   :  { %v130_v23 = vld [vmem:[%s1963_s0 + $0x3b8] sm:$0xff] }
 0x25f   :  { %675 = vst [vmem:[%s1965_s2 + $0x380] sm:$0xff] %v537_v13  ;;  %676 = vst [vmem:[%s1965_s2 + $0x388] sm:$0xff] %v538_v14  ;;  %v406_v28 = vadd.f32 %v268_v24, %v130_v23  ;;  %v281_v14 = vld [vmem:[%s1964_s1 + $0x420] sm:$0xff] }
 0x261   :  { %v544_v38 = vmax.f32 %v406_v28, 0.0 }
 0x266   :  { %v131_v29 = vld [vmem:[%s1963_s0 + $0x3c0] sm:$0xff]  ;;  %v132_v31 = vld [vmem:[%s1963_s0 + $0x3c8] sm:$0xff] }
 0x267   :  { %677 = vst [vmem:[%s1965_s2 + $0x390] sm:$0xff] %v539_v20  ;;  %v407_v33 = vadd.f32 %v269_v30, %v131_v29  ;;  %v408_v39 = vadd.f32 %v270_v34, %v132_v31  ;;  %v283_v20 = vld [vmem:[%s1964_s1 + $0x430] sm:$0xff]  ;;  %v285_v30 = vld [vmem:[%s1964_s1 + $0x440] sm:$0xff] }
 0x269   :  { %v545_v44 = vmax.f32 %v407_v33, 0.0  ;;  %v546_v49 = vmax.f32 %v408_v39, 0.0 }
 0x26e   :  { %v133_v35 = vld [vmem:[%s1963_s0 + $0x3d0] sm:$0xff] }
 0x26f   :  { %678 = vst [vmem:[%s1965_s2 + $0x398] sm:$0xff] %v540_v25  ;;  %679 = vst [vmem:[%s1965_s2 + $0x3a0] sm:$0xff] %v541_v26  ;;  %v409_v40 = vadd.f32 %v271_v36, %v133_v35  ;;  %v284_v26 = vld [vmem:[%s1964_s1 + $0x438] sm:$0xff] }
 0x271   :  { %v547_v50 = vmax.f32 %v409_v40, 0.0 }
 0x276   :  { %v134_v41 = vld [vmem:[%s1963_s0 + $0x3d8] sm:$0xff]  ;;  %v135_v43 = vld [vmem:[%s1963_s0 + $0x3e0] sm:$0xff] }
 0x277   :  { %680 = vst [vmem:[%s1965_s2 + $0x3a8] sm:$0xff] %v542_v32  ;;  %v410_v45 = vadd.f32 %v272_v42, %v134_v41  ;;  %v411_v51 = vadd.f32 %v273_v46, %v135_v43  ;;  %v286_v32 = vld [vmem:[%s1964_s1 + $0x448] sm:$0xff] }
 0x279   :  { %v548_v56 = vmax.f32 %v410_v45, 0.0  ;;  %v549_v61 = vmax.f32 %v411_v51, 0.0 }
 0x27e   :  { %v136_v47 = vld [vmem:[%s1963_s0 + $0x3e8] sm:$0xff] }
 0x27f   :  { %681 = vst [vmem:[%s1965_s2 + $0x3b0] sm:$0xff] %v543_v37  ;;  %682 = vst [vmem:[%s1965_s2 + $0x3b8] sm:$0xff] %v544_v38  ;;  %v412_v52 = vadd.f32 %v274_v48, %v136_v47 }
 0x281   :  { %v550_v62 = vmax.f32 %v412_v52, 0.0 }
 0x286   :  { %v137_v53 = vld [vmem:[%s1963_s0 + $0x3f0] sm:$0xff]  ;;  %v138_v55 = vld [vmem:[%s1963_s0 + $0x3f8] sm:$0xff] }
 0x287   :  { %683 = vst [vmem:[%s1965_s2 + $0x3c0] sm:$0xff] %v545_v44  ;;  %v413_v57 = vadd.f32 %v275_v54, %v137_v53  ;;  %v414_v63 = vadd.f32 %v276_v58, %v138_v55 }
 0x289   :  { %v551_v4 = vmax.f32 %v413_v57, 0.0  ;;  %v552_v9 = vmax.f32 %v414_v63, 0.0 }
 0x28e   :  { %v139_v59 = vld [vmem:[%s1963_s0 + $0x400] sm:$0xff] }
 0x28f   :  { %684 = vst [vmem:[%s1965_s2 + $0x3c8] sm:$0xff] %v546_v49  ;;  %685 = vst [vmem:[%s1965_s2 + $0x3d0] sm:$0xff] %v547_v50  ;;  %v415_v0 = vadd.f32 %v277_v60, %v139_v59 }
 0x291   :  { %v553_v10 = vmax.f32 %v415_v0, 0.0 }
 0x296   :  { %v140_v1 = vld [vmem:[%s1963_s0 + $0x408] sm:$0xff]  ;;  %v141_v3 = vld [vmem:[%s1963_s0 + $0x410] sm:$0xff] }
 0x297   :  { %686 = vst [vmem:[%s1965_s2 + $0x3d8] sm:$0xff] %v548_v56  ;;  %v416_v5 = vadd.f32 %v278_v2, %v140_v1  ;;  %v417_v11 = vadd.f32 %v279_v6, %v141_v3 }
 0x299   :  { %v554_v16 = vmax.f32 %v416_v5, 0.0  ;;  %v555_v21 = vmax.f32 %v417_v11, 0.0 }
 0x29e   :  { %v142_v7 = vld [vmem:[%s1963_s0 + $0x418] sm:$0xff] }
 0x29f   :  { %687 = vst [vmem:[%s1965_s2 + $0x3e0] sm:$0xff] %v549_v61  ;;  %688 = vst [vmem:[%s1965_s2 + $0x3e8] sm:$0xff] %v550_v62  ;;  %v418_v12 = vadd.f32 %v280_v8, %v142_v7 }
 0x2a1   :  { %v556_v22 = vmax.f32 %v418_v12, 0.0 }
 0x2a6   :  { %v143_v13 = vld [vmem:[%s1963_s0 + $0x420] sm:$0xff]  ;;  %v144_v15 = vld [vmem:[%s1963_s0 + $0x428] sm:$0xff] }
 0x2a7   :  { %689 = vst [vmem:[%s1965_s2 + $0x3f0] sm:$0xff] %v551_v4  ;;  %v419_v17 = vadd.f32 %v281_v14, %v143_v13  ;;  %v420_v23 = vadd.f32 %v282_v18, %v144_v15 }
 0x2a9   :  { %v557_v28 = vmax.f32 %v419_v17, 0.0  ;;  %v558_v33 = vmax.f32 %v420_v23, 0.0 }
 0x2ae   :  { %v145_v19 = vld [vmem:[%s1963_s0 + $0x430] sm:$0xff] }
 0x2af   :  { %690 = vst [vmem:[%s1965_s2 + $0x3f8] sm:$0xff] %v552_v9  ;;  %691 = vst [vmem:[%s1965_s2 + $0x400] sm:$0xff] %v553_v10  ;;  %v421_v24 = vadd.f32 %v283_v20, %v145_v19 }
 0x2b1   :  { %v559_v34 = vmax.f32 %v421_v24, 0.0 }
 0x2b6   :  { %v146_v25 = vld [vmem:[%s1963_s0 + $0x438] sm:$0xff]  ;;  %v147_v27 = vld [vmem:[%s1963_s0 + $0x440] sm:$0xff] }
 0x2b7   :  { %692 = vst [vmem:[%s1965_s2 + $0x408] sm:$0xff] %v554_v16  ;;  %v422_v29 = vadd.f32 %v284_v26, %v146_v25  ;;  %v423_v35 = vadd.f32 %v285_v30, %v147_v27 }
 0x2b9   :  { %v560_v37 = vmax.f32 %v422_v29, 0.0  ;;  %v561_v38 = vmax.f32 %v423_v35, 0.0 }
 0x2be   :  { %v148_v31 = vld [vmem:[%s1963_s0 + $0x448] sm:$0xff] }
 0x2bf   :  { %693 = vst [vmem:[%s1965_s2 + $0x410] sm:$0xff] %v555_v21  ;;  %694 = vst [vmem:[%s1965_s2 + $0x418] sm:$0xff] %v556_v22  ;;  %v424_v36 = vadd.f32 %v286_v32, %v148_v31 }
 0x2c0   :  { %695 = vst [vmem:[%s1965_s2 + $0x420] sm:$0xff] %v557_v28  ;;  %696 = vst [vmem:[%s1965_s2 + $0x428] sm:$0xff] %v558_v33 }
 0x2c1   :  { %697 = vst [vmem:[%s1965_s2 + $0x430] sm:$0xff] %v559_v34  ;;  %v562_v39 = vmax.f32 %v424_v36, 0.0  ;;  %698 = vst [vmem:[%s1965_s2 + $0x438] sm:$0xff] %v560_v37 }
 0x2c2   :  { %699 = vst [vmem:[%s1965_s2 + $0x440] sm:$0xff] %v561_v38 }
 0x2c3   :  { %701 = vst.msk [vmem:[%s1965_s2 + $0x448] sm:$0xff] %vm700_vm0, %v562_v39 }

</bundles_post_ra>
